<compile_context>
chip_gen: v5e
topology: v5e:2x2
jax: 0.10.0
libtpu: 0.0.40
codegen_flags: <defaults>
</compile_context>

<pallas_src>
import math

import jax
import jax.numpy as jnp
from jax.experimental import pallas as pl
from jax.experimental.pallas import tpu as pltpu

_LANE = 128


def _sublane_for(dtype) -> int:
    return {4: 8, 2: 16, 1: 32}.get(jnp.dtype(dtype).itemsize, 8)


def _round_up(a: int, b: int) -> int:
    return ((a + b - 1) // b) * b


def _ew_linear_kernel(x_ref, w_ref, b_ref, o_ref):
    # y = x * w + b ; w_ref / b_ref are (1, C) f32 rows broadcast over the row axis.
    x = x_ref[...].astype(jnp.float32)
    o_ref[...] = (x * w_ref[...] + b_ref[...]).astype(o_ref.dtype)


def elementwise_linear(x, weight=None, bias=None, *, target_tile_bytes=4 << 20):
    """ElementWiseLinear forward: y = x * weight + bias (per-feature scale+shift).

    x: (..., size); weight / bias: (size,) or None (a None term is skipped, as in
    the PyTorch module).  Returns an array with x's shape and dtype.
    """
    if weight is None and bias is None:
        return x  # module forward is the identity in this configuration

    orig_shape = x.shape
    size = orig_shape[-1]
    dtype = x.dtype
    itemsize = jnp.dtype(dtype).itemsize

    # Parameters are tiny; keep them in f32 (like the PyTorch module's params) and
    # cast the result back to x.dtype.
    w = jnp.ones((size,), jnp.float32) if weight is None else weight.astype(jnp.float32)
    b = jnp.zeros((size,), jnp.float32) if bias is None else bias.astype(jnp.float32)

    n_rows = math.prod(orig_shape[:-1])

    # Lane folding: if the (small) feature dim divides 128 and the element count
    # allows it, reshape (free) so the kernel sees a 128-wide lane-dense layout.
    fold = 1
    if size < _LANE and _LANE % size == 0 and (n_rows * size) % _LANE == 0:
        fold = _LANE // size
    c = size * fold
    n_rows = (n_rows * size) // c

    x2 = x.reshape(n_rows, c)
    w2 = jnp.tile(w, fold).reshape(1, c)
    b2 = jnp.tile(b, fold).reshape(1, c)

    # Row tile from a VMEM byte budget (x tile + out tile, double-buffered, well
    # inside every generation's scoped-VMEM default), rounded to the dtype-aware
    # sublane multiple; keep >=4 grid steps when there is enough work (v7x: 2 TCs).
    sub = _sublane_for(dtype)
    tm = max(sub, (target_tile_bytes // max(1, c * itemsize)) // sub * sub)
    if n_rows >= 4 * sub:
        tm = min(tm, _round_up(pl.cdiv(n_rows, 4), sub))
    if tm >= n_rows:
        tm = n_rows  # single full-extent block (legal for any row count)
    grid = (pl.cdiv(n_rows, tm),)

    out = pl.pallas_call(
        _ew_linear_kernel,
        out_shape=jax.ShapeDtypeStruct((n_rows, c), dtype),
        grid=grid,
        in_specs=[
            pl.BlockSpec((tm, c), lambda i: (i, 0)),   # x row tile (pipelined)
            pl.BlockSpec((1, c), lambda i: (0, 0)),    # weight, resident across grid
            pl.BlockSpec((1, c), lambda i: (0, 0)),    # bias, resident across grid
        ],
        out_specs=pl.BlockSpec((tm, c), lambda i: (i, 0)),
        input_output_aliases={0: 0},                   # mirrors the module's inplace=True
        compiler_params=pltpu.CompilerParams(
            dimension_semantics=("parallel",),
            vmem_limit_bytes=48 << 20,
        ),
        cost_estimate=pl.CostEstimate(
            flops=2 * n_rows * c,
            transcendentals=0,
            bytes_accessed=2 * n_rows * c * itemsize + 2 * c * 4,
        ),
    )(x2, w2, b2)

    return out.reshape(orig_shape)


if __name__ == "__main__":
    key = jax.random.PRNGKey(0)
    k_x, k_w, k_b, k_x2 = jax.random.split(key, 4)

    # Small shapes consistent with the module: (batch, seq, hidden) with hidden == size.
    batch, seq, size = 4, 64, 32
    x = jax.random.normal(k_x, (batch, seq, size), dtype=jnp.float32)

    # Module default init (reset_parameters): weight = ones, bias = zeros.
    w_default = jnp.ones((size,), jnp.float32)
    b_default = jnp.zeros((size,), jnp.float32)
    # Non-trivial parameters to exercise the math.
    w = jax.random.normal(k_w, (size,), jnp.float32)
    b = jax.random.normal(k_b, (size,), jnp.float32)

    ew = jax.jit(elementwise_linear)

    out_default = jax.block_until_ready(ew(x, w_default, b_default))
    out = jax.block_until_ready(ew(x, w, b))
    out_no_bias = jax.block_until_ready(ew(x, w, None))
    out_no_weight = jax.block_until_ready(ew(x, None, b))

    # A feature dim that is neither a multiple nor a divisor of 128 exercises the
    # full-feature-dim (masked-store, no-padding) path.
    size2 = 48
    x48 = jax.random.normal(k_x2, (2, 16, size2), dtype=jnp.float32)
    w48 = jnp.linspace(-1.0, 1.0, size2, dtype=jnp.float32)
    b48 = jnp.linspace(0.5, -0.5, size2, dtype=jnp.float32)
    out48 = jax.block_until_ready(ew(x48, w48, b48))

    assert out.shape == x.shape
    assert jnp.allclose(out_default, x * w_default + b_default, atol=1e-6, rtol=1e-6)
    assert jnp.allclose(out, x * w + b, atol=1e-6, rtol=1e-6)
    assert jnp.allclose(out_no_bias, x * w, atol=1e-6, rtol=1e-6)
    assert jnp.allclose(out_no_weight, x + b, atol=1e-6, rtol=1e-6)
    assert jnp.allclose(out48, x48 * w48 + b48, atol=1e-6, rtol=1e-6)

    print("KERNEL_OK")
</pallas_src>

<mosaic_0001>
module attributes {stable_mosaic.version = 11 : i64} {
  func.func @_ew_linear_kernel(%arg0: i32, %arg1: memref<16x128xf32, #tpu.memory_space<vmem>>, %arg2: memref<1x128xf32, #tpu.memory_space<vmem>>, %arg3: memref<1x128xf32, #tpu.memory_space<vmem>>, %arg4: memref<16x128xf32, #tpu.memory_space<vmem>>) attributes {dimension_semantics = [#tpu.dimension_semantics<parallel>], iteration_bounds = array<i64: 4>, scalar_prefetch = 0 : i64, scratch_operands = 0 : i64, tpu.core_type = #tpu.core_type<tc>, window_params = [{transform_indices = @transform_0, window_bounds = array<i64: 16, 128>}, {pipeline_mode = #tpu.pipeline_mode<synchronous>, transform_indices = @transform_1, window_bounds = array<i64: 1, 128>}, {pipeline_mode = #tpu.pipeline_mode<synchronous>, transform_indices = @transform_2, window_bounds = array<i64: 1, 128>}, {transform_indices = @transform_3, window_bounds = array<i64: 16, 128>}]} {
    %c0 = arith.constant 0 : index
    %c0_0 = arith.constant 0 : index
    %0 = vector.load %arg1[%c0, %c0_0] : memref<16x128xf32, #tpu.memory_space<vmem>>, vector<16x128xf32>
    %c0_1 = arith.constant 0 : index
    %c0_2 = arith.constant 0 : index
    %1 = vector.load %arg2[%c0_1, %c0_2] : memref<1x128xf32, #tpu.memory_space<vmem>>, vector<1x128xf32>
    %2 = vector.broadcast %1 : vector<1x128xf32> to vector<16x128xf32>
    %3 = arith.mulf %0, %2 : vector<16x128xf32>
    %c0_3 = arith.constant 0 : index
    %c0_4 = arith.constant 0 : index
    %4 = vector.load %arg3[%c0_3, %c0_4] : memref<1x128xf32, #tpu.memory_space<vmem>>, vector<1x128xf32>
    %5 = vector.broadcast %4 : vector<1x128xf32> to vector<16x128xf32>
    %6 = arith.addf %3, %5 : vector<16x128xf32>
    %c0_5 = arith.constant 0 : index
    %c0_6 = arith.constant 0 : index
    %7 = vector.load %arg4[%c0_5, %c0_6] : memref<16x128xf32, #tpu.memory_space<vmem>>, vector<16x128xf32>
    tpu.vector_store %arg4[%c0_5, %c0_6], %6 {strides = array<i32>} : memref<16x128xf32, #tpu.memory_space<vmem>>, vector<16x128xf32>,
    return
  }
  func.func @transform_0(%arg0: i32) -> (i32, i32) {
    %c0_i32 = arith.constant 0 : i32
    %c0_i32_0 = arith.constant 0 : i32
    return %arg0, %c0_i32 : i32, i32
  }
  func.func @transform_1(%arg0: i32) -> (i32, i32) {
    %c0_i32 = arith.constant 0 : i32
    %c0_i32_0 = arith.constant 0 : i32
    %c0_i32_1 = arith.constant 0 : i32
    return %c0_i32, %c0_i32_0 : i32, i32
  }
  func.func @transform_2(%arg0: i32) -> (i32, i32) {
    %c0_i32 = arith.constant 0 : i32
    %c0_i32_0 = arith.constant 0 : i32
    %c0_i32_1 = arith.constant 0 : i32
    return %c0_i32, %c0_i32_0 : i32, i32
  }
  func.func @transform_3(%arg0: i32) -> (i32, i32) {
    %c0_i32 = arith.constant 0 : i32
    %c0_i32_0 = arith.constant 0 : i32
    return %arg0, %c0_i32 : i32, i32
  }
}

</mosaic_0001>

<bundles_post_ra>
// kernel: tile.14
= control target key start
LH: loop header
LB: loop body
LE: loop exit
PB: predicated region body
PF: predicated region fallthrough
CT: control target
= control target key end

     0   :  { %s37_s8 = smov 32   ;;  %s38_s9 = smov 64   ;;  %vm7_vm0 = vcmask 261120   ;;  %vm13_vm1 = vcmask 1048320   ;;  %vm19_vm2 = vcmask 785920   ;;  %vm25_vm3 = vcmask 523520   ;;  %s55_s0 = inlined_call_operand.vmem [shape: f32[4,32], index: 0, kind: input, shape index: {}]   ;;  %s56_s1 = inlined_call_operand.vmem [shape: f32[1,128], index: 1, kind: output, shape index: {}]  }
   0x1   :  { %v4_v0 = vld [vmem:[%s55_s0] sm:$0xf]  ;;  %s36_s0 = smov 96  }
   0x2   :  { %5 = vst [vmem:[#allocation1] sm:$0xf] %v4_v0 }
   0x9   :  { %v10_v1 = vld [vmem:[#allocation1 + $0x3] sm:$0x1]   ;;  %v22_v2 = vld [vmem:[#allocation1 + $0x1] sm:$0x1]   ;;  %v16_v3 = vld [vmem:[#allocation1 + $0x2] sm:$0x1]  }
   0xa   :  { %11 = vrot.lane.b32.xlu0 %v10_v1, %s36_s0  ;;  %23 = vrot.lane.b32.xlu1 %v22_v2, %s37_s8  ;;  %v6_v4 = vld [vmem:[#allocation1] sm:$0x1]  }
   0xb   :  { %8 = vst.msk [vmem:[#allocation0] sm:$0x1] %vm7_vm0, %v6_v4  }
  0x12   :  { %17 = vrot.lane.b32.xlu0 %v16_v3, %s38_s9 }
  0x7c   :  { %v12_v5 = vpop.permute.xlu0 %11   ;;  %v24_v6 = vpop.permute.xlu1 %23  }
  0x7d   :  { %14 = vst.msk [vmem:[#allocation0] sm:$0x1] %vm13_vm1, %v12_v5  }
  0x84   :  { %v18_v7 = vpop.permute.xlu0 %17  }
  0x85   :  { %20 = vst.msk [vmem:[#allocation0] sm:$0x1] %vm19_vm2, %v18_v7  }
  0x86   :  { %26 = vst.msk [vmem:[#allocation0] sm:$0x1] %vm25_vm3, %v24_v6  }
  0x8d   :  { %v29_v8 = vld [vmem:[#allocation0] sm:$0x1] }
  0x8e   :  { %32 = vst [vmem:[%s56_s1] sm:$0x1] %v29_v8 }

// kernel: tile.13
= control target key start
LH: loop header
LB: loop body
LE: loop exit
PB: predicated region body
PF: predicated region fallthrough
CT: control target
= control target key end

     0   :  { %2 = vsyncpa [#allocation1], 0  ;;  %s48_s8 = smov [#allocation0]   ;;  %s65_s0 = inlined_call_operand.hbm [shape: f32[32], index: 0, kind: input, shape index: {}]   ;;  %s66_s1 = inlined_call_operand.vmem [shape: f32[4,32], index: 1, kind: output, shape index: {}]  }
   0x1   :  { %s8_s0 = sshll.u32 %s65_s0, 4  ;;  %s10_s9 = sshll.u32 %s48_s8, 4  ;;  %s9_s0 = int_to_ptr.hbm [resolvable:$true] %s8_s0  ;;  %s11_s9 = int_to_ptr.vmem [resolvable:$true] %s10_s9 }
   0x2   :  { %13 = dma.hbm_to_vmem [thread:$0]  %s9_s0, 16, %s11_s9, [#allocation1]  }
   0x3   :  { %46 = dma.done.wait [#allocation1], 16  }
   0x4   :  { %47 = vsyncadd [#allocation1], 4294967280  ;;  %v18_v0 = vld [vmem:[#allocation0] ss:$0 sm:$0xff] }
   0x5   :  { %19 = vst [vmem:[%s66_s1] sm:$0xf] %v18_v0 }
   0x6   :  { %20 = vsyncpa [#allocation1], 1 }

// kernel: tile.18
= control target key start
LH: loop header
LB: loop body
LE: loop exit
PB: predicated region body
PF: predicated region fallthrough
CT: control target
= control target key end

     0   :  { %s22_s0 = inlined_call_operand.vmem [shape: f32[32], index: 0, kind: input, shape index: {}]   ;;  %s23_s1 = inlined_call_operand.vmem [shape: f32[4,32], index: 1, kind: output, shape index: {}]  }
   0x1   :  { %v4_v0 = vld [vmem:[%s22_s0] ss:$0 sm:$0xff] }
   0x2   :  { %5 = vst [vmem:[%s23_s1] sm:$0xf] %v4_v0 }

// kernel: elementwise_linear.1
= control target key start
LH: loop header
LB: loop body
LE: loop exit
PB: predicated region body
PF: predicated region fallthrough
CT: control target
= control target key end

     0   :  { %s271_s12 = smov 0   ;;  %s307_s0 = inlined_call_operand.vmem [shape: f32[64,128], index: 0, kind: input, shape index: {}, may-alias: {0,3}]   ;;  %s308_s1 = inlined_call_operand.vmem [shape: f32[1,128], index: 1, kind: input, shape index: {}]   ;;  %s309_s2 = inlined_call_operand.vmem [shape: f32[1,128], index: 2, kind: input, shape index: {}]   ;;  %s310_s3 = inlined_call_operand.vmem [shape: f32[64,128], index: 3, kind: output, shape index: {}, may-alias: {0,3}]  }
   0x1 LB: > { %s246_s13 = sadd.s32 4294967295, %s273_s12   ;;  %p250_p0 = scmp.ge.s32.totalorder %s273_s12, 1  ;;  %s273_s12 = sphi %s271_s12, %s13_s12  }
   0x2   : > { %p138_p1 = scmp.lt.s32.totalorder %s273_s12, 5 }
   0x4   : > { %p139_p2 = pnand %p250_p0, %p138_p1 }
   0x5   : > { %s251_s14 = sshll.u32 (!%p139_p2), %s246_s13, 1 }
   0x6   : > { %142 = sbr.rel (%p139_p2) target bundleno = 21 (0x15), region = 32  ;;  %p163_p3 = scmp.lt.s32.totalorder (!%p139_p2), %s251_s14, 7 }
   0xb   : > { %s312_s14 = smov (!%p163_p3, %s251_s14), 7  ;;  %v265_v0 = vld [vmem:[%s308_s1] ss:$0 sm:$0xff] }
   0xc   : > { %s252_s17 = sshll.u32 %s312_s14, 3  ;;  %v266_v1 = vld [vmem:[%s309_s2] ss:$0 sm:$0xff] }
   0xd   : > { %s166_s20 = scalar_lea.vmem %s307_s0, %s252_s17  ;;  %s172_s25 = scalar_lea.vmem %s310_s3, %s252_s17 }
   0xe   : > { %v174_v2 = vld [vmem:[%s166_s20] sm:$0xff]  ;;  %v175_v3 = vld [vmem:[%s166_s20 + $0x8] sm:$0xff] }
   0xf   : > { %v180_v4 = vmul.f32 %v265_v0, %v174_v2  ;;  %v181_v5 = vmul.f32 %v265_v0, %v175_v3 }
  0x11   : > { %v186_v6 = vadd.f32 %v266_v1, %v180_v4  ;;  %v187_v7 = vadd.f32 %v266_v1, %v181_v5 }
  0x13   : > { %188 = vst [vmem:[%s172_s25] sm:$0xff] %v186_v6 }
  0x14   : > { %189 = vst [vmem:[%s172_s25 + $0x8] sm:$0xff] %v187_v7 }
  0x15 PF: > { %s13_s12 = sadd.s32 1, %s273_s12  }
  0x16   : > { %p10_p4 = scmp.ge.s32.totalorder %s13_s12, 6  }
  0x18   :  { %12 = sbr.rel (!%p10_p4) target bundleno = 1 (0x1), region = 62 }

</bundles_post_ra>
